<compile_context>
chip_gen: v6e
topology: v6e:2x2x1
jax: 0.10.0
libtpu: 0.0.40
codegen_flags: <defaults>
</compile_context>

<pallas_src>
import jax
import jax.numpy as jnp
from jax.experimental import pallas as pl
from jax.experimental.pallas import tpu as pltpu


def _round_up(n: int, m: int) -> int:
    return ((n + m - 1) // m) * m


def _mlp_kernel(x_ref, w1_ref, b1_ref, w2_ref, b2_ref, o_ref):
    # x_ref : [6,  TM]  activations, batch on the 128-lane axis (lane-dense)
    # w1_ref: [50, 6]   PyTorch layout, VMEM-resident (constant index map)
    # b1_ref: [50, 1]
    # w2_ref: [3,  50]
    # b2_ref: [3,  1]
    # o_ref : [3,  TM]  lane-dense output tile
    h = jnp.dot(w1_ref[...], x_ref[...], preferred_element_type=jnp.float32)
    h = jnp.tanh(h + b1_ref[...])                       # [50, TM]
    out = jnp.dot(w2_ref[...], h, preferred_element_type=jnp.float32)
    o_ref[...] = (out + b2_ref[...]).astype(o_ref.dtype)  # [3, TM]


def sat_simple_net_6(x, w1, b1, w2, b2, *, tm: int = 2048):
    """Forward pass of SatSimpleNet_6.

    x : [B, 6]   float32
    w1: [50, 6]  float32 (PyTorch nn.Linear layout: [out_features, in_features])
    b1: [50]     float32
    w2: [3, 50]  float32
    b2: [3]      float32
    returns [B, 3] float32
    """
    B = x.shape[0]
    in_f = w1.shape[1]
    hid = w1.shape[0]
    out_f = w2.shape[0]

    b1c = b1.reshape(hid, 1).astype(jnp.float32)
    b2c = b2.reshape(out_f, 1).astype(jnp.float32)

    # Tile size: multiple of 128 lanes, capped by the (padded) batch.
    tm = max(128, _round_up(tm, 128))
    tm_eff = min(tm, _round_up(B, 128))
    b_pad = _round_up(B, tm_eff)
    grid = (pl.cdiv(b_pad, tm_eff),)

    # Layout plumbing in the wrapper: batch goes on the lane axis.
    x_t = jnp.transpose(x)                                  # [6, B]
    if b_pad != B:
        x_t = jnp.pad(x_t, ((0, 0), (0, b_pad - B)))        # [6, b_pad]

    out_t = pl.pallas_call(
        _mlp_kernel,
        out_shape=jax.ShapeDtypeStruct((out_f, b_pad), x.dtype),
        grid=grid,
        in_specs=[
            pl.BlockSpec((in_f, tm_eff), lambda i: (0, i)),   # x tile, streamed
            pl.BlockSpec((hid, in_f), lambda i: (0, 0)),      # w1, resident
            pl.BlockSpec((hid, 1), lambda i: (0, 0)),         # b1, resident
            pl.BlockSpec((out_f, hid), lambda i: (0, 0)),     # w2, resident
            pl.BlockSpec((out_f, 1), lambda i: (0, 0)),       # b2, resident
        ],
        out_specs=pl.BlockSpec((out_f, tm_eff), lambda i: (0, i)),
        compiler_params=pltpu.CompilerParams(
            dimension_semantics=("parallel",),   # split batch across TCs (v7x)
            vmem_limit_bytes=32 * 1024 * 1024,   # tiles are << 1 MiB; plenty
        ),
    )(x_t, w1, b1c, w2, b2c)

    return jnp.transpose(out_t)[:B]              # back to [B, 3]


def init_params(key):
    """Deterministic init matching nn.Linear's default U(-1/sqrt(fan_in), +1/sqrt(fan_in))."""
    k1, k2, k3, k4 = jax.random.split(key, 4)
    bound1 = 1.0 / jnp.sqrt(6.0)
    bound2 = 1.0 / jnp.sqrt(50.0)
    w1 = jax.random.uniform(k1, (50, 6), jnp.float32, -bound1, bound1)
    b1 = jax.random.uniform(k2, (50,), jnp.float32, -bound1, bound1)
    w2 = jax.random.uniform(k3, (3, 50), jnp.float32, -bound2, bound2)
    b2 = jax.random.uniform(k4, (3,), jnp.float32, -bound2, bound2)
    return w1, b1, w2, b2


if __name__ == "__main__":
    key = jax.random.PRNGKey(0)
    k_x, k_p = jax.random.split(key)

    # Small deterministic input; B deliberately not a multiple of the tile so
    # the padding path is exercised, and tm=128 so the batch grid takes >1 step.
    B = 300
    x = jax.random.normal(k_x, (B, 6), jnp.float32)
    w1, b1, w2, b2 = init_params(k_p)

    out = sat_simple_net_6(x, w1, b1, w2, b2, tm=128)
    out = jax.block_until_ready(out)

    # Reference check against plain JAX (PyTorch semantics: x @ W.T + b).
    ref = jnp.tanh(x @ w1.T + b1) @ w2.T + b2
    assert out.shape == (B, 3)
    assert jnp.allclose(out, ref, atol=1e-4, rtol=1e-4), "mismatch vs reference"

    print("KERNEL_OK")
</pallas_src>

<mosaic_0001>
module attributes {stable_mosaic.version = 11 : i64} {
  func.func @_mlp_kernel(%arg0: i32, %arg1: memref<6x128xf32, #tpu.memory_space<vmem>>, %arg2: memref<50x6xf32, #tpu.memory_space<vmem>>, %arg3: memref<50x1xf32, #tpu.memory_space<vmem>>, %arg4: memref<3x50xf32, #tpu.memory_space<vmem>>, %arg5: memref<3x1xf32, #tpu.memory_space<vmem>>, %arg6: memref<3x128xf32, #tpu.memory_space<vmem>>) attributes {dimension_semantics = [#tpu.dimension_semantics<parallel>], iteration_bounds = array<i64: 3>, scalar_prefetch = 0 : i64, scratch_operands = 0 : i64, tpu.core_type = #tpu.core_type<tc>, window_params = [{transform_indices = @transform_0, window_bounds = array<i64: 6, 128>}, {pipeline_mode = #tpu.pipeline_mode<synchronous>, transform_indices = @transform_1, window_bounds = array<i64: 50, 6>}, {pipeline_mode = #tpu.pipeline_mode<synchronous>, transform_indices = @transform_2, window_bounds = array<i64: 50, 1>}, {pipeline_mode = #tpu.pipeline_mode<synchronous>, transform_indices = @transform_3, window_bounds = array<i64: 3, 50>}, {pipeline_mode = #tpu.pipeline_mode<synchronous>, transform_indices = @transform_4, window_bounds = array<i64: 3, 1>}, {transform_indices = @transform_5, window_bounds = array<i64: 3, 128>}]} {
    %c0 = arith.constant 0 : index
    %c0_0 = arith.constant 0 : index
    %0 = vector.load %arg2[%c0, %c0_0] : memref<50x6xf32, #tpu.memory_space<vmem>>, vector<50x6xf32>
    %c0_1 = arith.constant 0 : index
    %c0_2 = arith.constant 0 : index
    %1 = vector.load %arg1[%c0_1, %c0_2] : memref<6x128xf32, #tpu.memory_space<vmem>>, vector<6x128xf32>
    %cst = arith.constant dense<0.000000e+00> : vector<50x128xf32>
    %2 = tpu.matmul %0, %1, %cst {dimension_numbers = #tpu.dot_dimension_numbers<[1], [0], [0], [1], [0, 0, 1, 1], [], []>} : vector<50x6xf32>, vector<6x128xf32>, vector<50x128xf32> -> vector<50x128xf32>
    %c0_3 = arith.constant 0 : index
    %c0_4 = arith.constant 0 : index
    %3 = vector.load %arg3[%c0_3, %c0_4] : memref<50x1xf32, #tpu.memory_space<vmem>>, vector<50x1xf32>
    %4 = vector.broadcast %3 : vector<50x1xf32> to vector<50x128xf32>
    %5 = arith.addf %2, %4 : vector<50x128xf32>
    %6 = math.tanh %5 : vector<50x128xf32>
    %c0_5 = arith.constant 0 : index
    %c0_6 = arith.constant 0 : index
    %7 = vector.load %arg4[%c0_5, %c0_6] : memref<3x50xf32, #tpu.memory_space<vmem>>, vector<3x50xf32>
    %cst_7 = arith.constant dense<0.000000e+00> : vector<3x128xf32>
    %8 = tpu.matmul %7, %6, %cst_7 {dimension_numbers = #tpu.dot_dimension_numbers<[1], [0], [0], [1], [0, 0, 1, 1], [], []>} : vector<3x50xf32>, vector<50x128xf32>, vector<3x128xf32> -> vector<3x128xf32>
    %c0_8 = arith.constant 0 : index
    %c0_9 = arith.constant 0 : index
    %9 = vector.load %arg5[%c0_8, %c0_9] : memref<3x1xf32, #tpu.memory_space<vmem>>, vector<3x1xf32>
    %10 = vector.broadcast %9 : vector<3x1xf32> to vector<3x128xf32>
    %11 = arith.addf %8, %10 : vector<3x128xf32>
    %c0_10 = arith.constant 0 : index
    %c0_11 = arith.constant 0 : index
    %12 = vector.load %arg6[%c0_10, %c0_11] : memref<3x128xf32, #tpu.memory_space<vmem>>, vector<3x128xf32>
    tpu.vector_store %arg6[%c0_10, %c0_11], %11 {strides = array<i32>} : memref<3x128xf32, #tpu.memory_space<vmem>>, vector<3x128xf32>,
    return
  }
  func.func @transform_0(%arg0: i32) -> (i32, i32) {
    %c0_i32 = arith.constant 0 : i32
    %c0_i32_0 = arith.constant 0 : i32
    return %c0_i32, %arg0 : i32, i32
  }
  func.func @transform_1(%arg0: i32) -> (i32, i32) {
    %c0_i32 = arith.constant 0 : i32
    %c0_i32_0 = arith.constant 0 : i32
    %c0_i32_1 = arith.constant 0 : i32
    return %c0_i32, %c0_i32_0 : i32, i32
  }
  func.func @transform_2(%arg0: i32) -> (i32, i32) {
    %c0_i32 = arith.constant 0 : i32
    %c0_i32_0 = arith.constant 0 : i32
    %c0_i32_1 = arith.constant 0 : i32
    return %c0_i32, %c0_i32_0 : i32, i32
  }
  func.func @transform_3(%arg0: i32) -> (i32, i32) {
    %c0_i32 = arith.constant 0 : i32
    %c0_i32_0 = arith.constant 0 : i32
    %c0_i32_1 = arith.constant 0 : i32
    return %c0_i32, %c0_i32_0 : i32, i32
  }
  func.func @transform_4(%arg0: i32) -> (i32, i32) {
    %c0_i32 = arith.constant 0 : i32
    %c0_i32_0 = arith.constant 0 : i32
    %c0_i32_1 = arith.constant 0 : i32
    return %c0_i32, %c0_i32_0 : i32, i32
  }
  func.func @transform_5(%arg0: i32) -> (i32, i32) {
    %c0_i32 = arith.constant 0 : i32
    %c0_i32_0 = arith.constant 0 : i32
    return %c0_i32, %arg0 : i32, i32
  }
}

</mosaic_0001>

<bundles_post_ra>
// kernel: tpu_custom_call.1
= control target key start
LH: loop header
LB: loop body
LE: loop exit
PB: predicated region body
PF: predicated region fallthrough
CT: control target
= control target key end

     0   :  { %10 = vsyncpa [#allocation3], 0  ;;  %s964_s0 = inlined_call_operand.vmem [shape: f32[6,384], index: 0, kind: input, shape index: {}]   ;;  %s965_s1 = inlined_call_operand.vmem [shape: f32[50,6], index: 1, kind: input, shape index: {}]   ;;  %s966_s2 = inlined_call_operand.vmem [shape: f32[50,1], index: 2, kind: input, shape index: {}]   ;;  %s967_s3 = inlined_call_operand.vmem [shape: f32[3,50], index: 3, kind: input, shape index: {}]   ;;  %s968_s4 = inlined_call_operand.vmem [shape: f32[3,1], index: 4, kind: input, shape index: {}]   ;;  %s969_s5 = inlined_call_operand.hbm [shape: f32[3,384], index: 5, kind: output, shape index: {}]  }
   0x1   :  { %12 = vsyncpa [#allocation3 + $0x1], 0  ;;  %s792_s18 = smov 0   ;;  %s794_s19 = smov 0  }
   0x2   :  { %s796_s20 = smov 0   ;;  %s798_s21 = smov 0  }
   0x3 LB: > { %s813_s22 = sadd.s32 4294967295, %s756_s21   ;;  %s562_s23 = sadd.s32 4294967294, %s756_s21   ;;  %s756_s21 = sphi %s798_s21, %s975_s21   ;;  %s752_s20 = sphi %s796_s20, %s974_s20   ;;  %s748_s19 = sphi %s794_s19, %s973_s19   ;;  %s744_s18 = sphi %s792_s18, %s972_s18  }
   0x4   : > { %s817_s24 = sadd.s32 1, %s756_s21   ;;  %s135_s25 = sadd.s32 1, %s752_s20 }
   0x5   : > { %s132_s26 = ssub.s32 %s756_s21, %s817_s24  ;;  %p145_p0 = scmp.ne.s32.totalorder %s752_s20, %s748_s19 }
   0x6   : > { %p133_p1 = scmp.eq.s32.totalorder %s132_s26, 0  ;;  %p146_p2 = scmp.eq.s32.totalorder %s813_s22, 2 }
   0x7   : > { %p151_p3 = scmp.ne.s32.totalorder %s748_s19, %s744_s18  ;;  %p152_p4 = scmp.eq.s32.totalorder %s562_s23, 2 }
   0x8   : > { %s828_s27 = scalar_select %p133_p1, %s752_s20, %s135_s25  }
   0x9   : > { %p830_p5 = por %p146_p2, %p145_p0  ;;  %p834_p6 = por %p152_p4, %p151_p3 }
   0xa   : > { %p565_p7 = scmp.ge.s32.totalorder %s756_s21, 1  ;;  %p189_p8 = scmp.lt.s32.totalorder %s756_s21, 4 }
   0xc   : > { %p190_p9 = pnand %p565_p7, %p189_p8 }
   0xd   : > { %p216_p10 = scmp.lt.s32.totalorder (!%p190_p9), %s813_s22, 2  ;;  %s579_s12 = sshll.u32 (!%p190_p9), %s813_s22, 6 }
   0xe   : > { %193 = sbr.rel (%p190_p9) target bundleno = 479 (0x1df), region = 40  ;;  %s929_s17 = scalar_lea.hbm (!%p190_p9), %s969_s5, %s579_s12 }
  0x13   : > { %v758_v0 = vmov 0.0   ;;  %vm759_vm0 = vmmov 0   ;;  %s217_s30 = scalar_select %p216_p10, %s813_s22, 2  ;;  %v760_v1 = vmov 0   ;;  %v234_v2 = vld [vmem:[%s966_s2 + $0x30] sm:$0x3] }
  0x14   : > { %598 = vmatprep.subr.mxu0 %v758_v0  ;;  %600 = vmatprep.mubr.msk.f32.mxu0 %vm759_vm0, %v758_v0  ;;  %v232_v3 = vld [vmem:[%s966_s2 + $0x20] sm:$0xff]  ;;  %vm292_vm1 = vcmask 1045504   ;;  %vm270_vm2 = vcmask 48128   ;;  %v233_v5 = vld [vmem:[%s966_s2 + $0x28] sm:$0xff]  ;;  %v231_v7 = vld [vmem:[%s966_s2 + $0x18] sm:$0xff]  ;;  %vm414_vm3 = vcmask 1041408  }
  0x15   : > { %680 = vset.pattern.permute.xlu0 %v760_v1  ;;  %681 = vset.pattern.permute.xlu1 %v760_v1  ;;  %s567_s10 = sshll.u32 %s217_s30, 3  ;;  %v220_v4 = vld [vmem:[%s965_s1] sm:$0xff]  ;;  %v221_v8 = vld [vmem:[%s965_s1 + $0x8] sm:$0xff]  ;;  %v230_v9 = vld [vmem:[%s966_s2 + $0x10] sm:$0xff]  ;;  %vm410_vm4 = vcmask 408576   ;;  %s761_s22 = smov [#allocation2]  }
  0x16   : > { %621 = vmatprep.subr.mxu1 %v758_v0  ;;  %635 = vmatprep.mubr.msk.f32.mxu1 %vm759_vm0, %v758_v0  ;;  %s219_s13 = scalar_lea.vmem %s964_s0, %s567_s10  ;;  %v229_v10 = vld [vmem:[%s966_s2 + $0x8] sm:$0xff]  ;;  %v222_v11 = vld [vmem:[%s965_s1 + $0x10] sm:$0xff]  ;;  %v228_v12 = vld [vmem:[%s966_s2] sm:$0xff]  ;;  %s213_s10 = sand.u32 1, %s748_s19  }
  0x17   : > { %267 = vperm.xlu0 %680, %v234_v2   ;;  %257 = vperm.xlu1 %681, %v232_v3   ;;  %v227_v6 = vld [vmem:[%s219_s13] sm:$0x3f]  ;;  %v223_v14 = vld [vmem:[%s965_s1 + $0x18] sm:$0xff]  ;;  %v225_v16 = vld [vmem:[%s965_s1 + $0x28] sm:$0xff]  ;;  %s566_s11 = sshll.u32 %s213_s10, 2  ;;  %s490_s23 = scalar_lea.sflag [#allocation3], %s213_s10 }
  0x18   : > { %599 = vmatpush3.msk.msra.mxu0 %vm292_vm1, %v227_v6  ;;  %v404_v13 = vld [vmem:[%s968_s4] sm:$0x7]  ;;  %v226_v17 = vld [vmem:[%s965_s1 + $0x30] sm:$0x3]  ;;  %s215_s13 = scalar_lea.vmem [#allocation2], %s566_s11  ;;  %s700_s26 = sshll.u32 %s761_s22, 4  ;;  %s701_s26 = int_to_ptr.vmem [resolvable:$false] %s700_s26 }
  0x19   : > { %601 = vmatmul.mubr.msk.f32.vlgmr.msra.gmra.mxu0 %vm270_vm2, %v220_v4  ;;  %v224_v15 = vld [vmem:[%s965_s1 + $0x20] sm:$0xff]  ;;  %s503_s14 = sshll.u32 %s215_s13, 4  ;;  %s702_s30 = scalar_lea.vmem %s701_s26, 128  ;;  %s504_s14 = int_to_ptr.vmem [resolvable:$true] %s503_s14 }
  0x1a   : > { %603 = vmatprep.mubr.msk.f32.mxu0 %vm759_vm0, %v758_v0  ;;  %v403_v52 = vld [vmem:[%s967_s3] sm:$0x7]  ;;  %s696_s25 = scalar_lea.vmem %s504_s14, 64  ;;  %p703_p0 = scmp.lt.s32.totalorder %s504_s14, %s701_s26 }
  0x1b   : > { %262 = vperm.xlu0 %680, %v233_v5   ;;  %252 = vperm.xlu1 %681, %v231_v7   ;;  %p697_p11 = scmp.ne.s32.totalorder %s504_s14, %s696_s25  ;;  %p704_p1 = scmp.lt.s32.totalorder %s702_s30, %s696_s25 }
  0x1d   : > { %604 = vmatmul.mubr.msk.f32.gmra.mxu0 %vm270_vm2, %v221_v8  ;;  %p698_p12 = pnand %p697_p11, %p830_p5  ;;  %p705_p2 = por %p704_p1, %p703_p0 }
  0x1e   : > { %606 = vmatprep.mubr.msk.f32.mxu0 %vm759_vm0, %v758_v0 }
  0x1f   : > { %247 = vperm.xlu0 %680, %v230_v9   ;;  %242 = vperm.xlu1 %681, %v229_v10   ;;  %p699_p13 = pneg %p698_p12 }
  0x21   : > { %607 = vmatmul.mubr.msk.f32.gmra.mxu0 %vm270_vm2, %v222_v11  ;;  %p706_p3 = pnand %p705_p2, %p699_p13 }
  0x22   : > { %609 = vmatprep.mubr.msk.f32.mxu0 %vm759_vm0, %v758_v0 }
  0x23   : > { %237 = vperm.xlu0 %680, %v228_v12   ;;  %407 = vperm.xlu1 %681, %v404_v13  }
  0x25   : > { %610 = vmatmul.mubr.msk.f32.gmra.mxu0 %vm270_vm2, %v223_v14 }
  0x26   : > { %612 = vmatprep.mubr.msk.f32.mxu0 %vm759_vm0, %v758_v0 }
  0x29   : > { %613 = vmatmul.mubr.msk.f32.gmra.mxu0 %vm270_vm2, %v224_v15 }
  0x2a   : > { %615 = vmatprep.mubr.msk.f32.mxu0 %vm759_vm0, %v758_v0 }
  0x2d   : > { %616 = vmatmul.mubr.msk.f32.gmra.mxu0 %vm270_vm2, %v225_v16 }
  0x2e   : > { %618 = vmatprep.mubr.msk.f32.mxu0 %vm759_vm0, %v758_v0 }
  0x31   : > { %619 = vmatmul.mubr.msk.f32.gmra.mxu0 %vm270_vm2, %v226_v17 }
  0x92   : > { %v268_v25 = vpop.permute.xlu0 %267  ;;  %v258_v28 = vpop.permute.xlu1 %257 }
  0x96   : > { %v263_v30 = vpop.permute.xlu0 %262  ;;  %v253_v33 = vpop.permute.xlu1 %252 }
  0x9a   : > { %v248_v37 = vpop.permute.xlu0 %247  ;;  %v243_v41 = vpop.permute.xlu1 %242 }
  0x9e   : > { %v238_v43 = vpop.permute.xlu0 %237  ;;  %v408_v54 = vpop.permute.xlu1 %407 }
  0xd9   : > { %v362_v18 = vpop.f32.mrf.mxu0 }
  0xda   : > { %v363_v45 = vadd.f32 %v362_v18, %v238_v43 }
  0xdb   : > { %v602_v19 = vpop.f32.mrf.mxu0 }
  0xdd   : > { %v367_v20 = vpop.f32.mrf.mxu0 }
  0xde   : > { %v368_v44 = vadd.f32 %v367_v20, %v243_v41 }
  0xdf   : > { %v605_v21 = vpop.f32.mrf.mxu0 }
  0xe1   : > { %v372_v22 = vpop.f32.mrf.mxu0 }
  0xe2   : > { %v373_v42 = vadd.f32 %v372_v22, %v248_v37 }
  0xe3   : > { %v608_v23 = vpop.f32.mrf.mxu0 }
  0xe5   : > { %v377_v24 = vpop.f32.mrf.mxu0 }
  0xe6   : > { %v378_v40 = vadd.f32 %v377_v24, %v253_v33 }
  0xe7   : > { %v611_v26 = vpop.f32.mrf.mxu0 }
  0xe9   : > { %v382_v27 = vpop.f32.mrf.mxu0 }
  0xea   : > { %v383_v39 = vadd.f32 %v382_v27, %v258_v28 }
  0xeb   : > { %v614_v29 = vpop.f32.mrf.mxu0 }
  0xed   : > { %v387_v31 = vpop.f32.mrf.mxu0 }
  0xee   : > { %v388_v35 = vadd.f32 %v387_v31, %v263_v30 }
  0xef   : > { %v617_v32 = vpop.f32.mrf.mxu0 }
  0xf1   : > { %v392_v34 = vpop.f32.mrf.mxu0 }
  0xf2   : > { %v393_v36 = vadd.f32 %v392_v34, %v268_v25 }
  0xf3   : > { %v620_v38 = vpop.f32.mrf.mxu0 }
  0xf4   : > { %682 = vtanh.f32 %v393_v36 }
  0xf5   : > { %684 = vtanh.f32 %v388_v35 }
  0xf6   : > { %686 = vtanh.f32 %v383_v39 }
  0xf7   : > { %688 = vtanh.f32 %v378_v40 }
  0xf8   : > { %690 = vtanh.f32 %v373_v42 }
  0xf9   : > { %692 = vtanh.f32 %v368_v44 }
  0xfa   : > { %694 = vtanh.f32 %v363_v45 }
 0x101   : > { %v683_v46 = vpop.eup %682 }
 0x102   : > { %622 = vmatpush3.msk.msra.mxu1 %vm414_vm3, %v683_v46  ;;  %v685_v47 = vpop.eup %684 }
 0x103   : > { %623 = vmatprep.subr.mxu1 %v758_v0  ;;  %v687_v48 = vpop.eup %686 }
 0x104   : > { %624 = vmatpush3.msra.mxu1 %v685_v47  ;;  %v689_v49 = vpop.eup %688 }
 0x105   : > { %625 = vmatprep.subr.mxu1 %v758_v0  ;;  %v691_v50 = vpop.eup %690 }
 0x106   : > { %626 = vmatpush3.msra.mxu1 %v687_v48  ;;  %v693_v51 = vpop.eup %692 }
 0x107   : > { %627 = vmatprep.subr.mxu1 %v758_v0  ;;  %v695_v53 = vpop.eup %694 }
 0x108   : > { %628 = vmatpush3.msra.mxu1 %v689_v49 }
 0x109   : > { %629 = vmatprep.subr.mxu1 %v758_v0 }
 0x10a   : > { %630 = vmatpush3.msra.mxu1 %v691_v50 }
 0x10b   : > { %631 = vmatprep.subr.mxu1 %v758_v0 }
 0x10c   : > { %632 = vmatpush3.msra.mxu1 %v693_v51 }
 0x10d   : > { %633 = vmatprep.subr.mxu1 %v758_v0 }
 0x10e   : > { %634 = vmatpush3.msra.mxu1 %v695_v53 }
 0x10f   : > { %636 = vmatmul.mubr.msk.f32.vlgmr.msra.gmra.mxu1 %vm410_vm4, %v403_v52 }
 0x1cf   : > { %v484_v55 = vpop.f32.mrf.mxu1 }
 0x1d0   : > { %v485_v56 = vadd.f32 %v484_v55, %v408_v54 }
 0x1d1   : > { %v637_v57 = vpop.f32.mrf.mxu1 }
 0x1d2   : > { %488 = vst [vmem:[%s215_s13] sm:$0x7] %v485_v56 }
 0x1d3   : > { %709 = shalt.err (!%p706_p3)
}
 0x1d4   : > { %s710_s6 = scalar_lea.hbm %s929_s17, 64  ;;  %s714_s9 = scalar_lea.hbm %s969_s5, 192 }
 0x1d5   : > { %p711_p4 = scmp.ne.s32.totalorder %s929_s17, %s710_s6  ;;  %p715_p9 = scmp.lt.s32.totalorder %s929_s17, %s969_s5 }
 0x1d6   : > { %p716_p10 = scmp.lt.s32.totalorder %s714_s9, %s710_s6 }
 0x1d7   : > { %p712_p7 = pnand %p711_p4, %p830_p5 }
 0x1d8   : > { %p717_p11 = por %p716_p10, %p715_p9 }
 0x1d9   : > { %p713_p8 = pneg %p712_p7 }
 0x1db   : > { %p718_p12 = pnand %p717_p11, %p713_p8 }
 0x1dd   : > { %721 = shalt.err (!%p718_p12)
}
 0x1de   : > { %638 = dma.vmem_to_hbm [thread:$0]  (%p830_p5), %s504_s14, 64, %s929_s17, %s490_s23  }
 0x1df PF: > { %p644_p13 = scmp.ge.s32.totalorder %s756_s21, 2  ;;  %s515_s12 = sand.u32 1, %s744_s18  }
 0x1e0   : > { %s516_s13 = scalar_lea.sflag [#allocation3], %s515_s12 }
 0x1e1   : > { %p641_p0 = pnand %p644_p13, %p834_p6 }
 0x1e3   : > { %p642_p1 = pneg %p641_p0 }
 0x1e5   : > { %739 = dma.done.wait (%p642_p1), %s516_s13, 64  }
 0x1e6   : > { %741 = vsyncadd (%p642_p1), %s516_s13, 4294967232  ;;  %p15_p2 = scmp.ge.s32.totalorder %s817_s24, 5   ;;  %s972_s18 = smov %s748_s19 }
 0x1e7   : > { %s973_s19 = smov %s752_s20  ;;  %s974_s20 = smov %s828_s27 }
 0x1e8   : > { %s975_s21 = smov %s817_s24  ;;  %17 = sbr.rel (!%p15_p2) target bundleno = 3 (0x3), region = 75 }
 0x1ed   :  { %521 = vsyncpa [#allocation3], 1 }
 0x1ee   :  { %523 = vsyncpa [#allocation3 + $0x1], 1 }

</bundles_post_ra>
